<compile_context>
chip_gen: v7x
topology: tpu7x:2x2x1
jax: 0.10.0
libtpu: 0.0.40
codegen_flags: <defaults>
</compile_context>

<pallas_src>
import numpy as np
import jax
import jax.numpy as jnp
from jax.experimental import pallas as pl
from jax.experimental.pallas import tpu as pltpu

K = 3
PAD = (K - 1) // 2  # = 1

_MAX_PACK = 16  # cap on rows packed into the lane dim (bounds in-kernel unrolling)


def _roll(p, shift, axis, fast):
    """Cyclic shift with jnp.roll semantics; XLU pltpu.roll when `fast`."""
    n = p.shape[axis]
    shift = shift % n
    if shift == 0:
        return p
    if fast:
        return pltpu.roll(p, shift, axis)
    return jnp.roll(p, shift, axis)


def _make_kernel(*, k, W, has_halo):
    """3x3 reflect-pad conv on a row-packed tile.

    The tile holds TR packed rows of width Wp = k*W; packed element (r, c*W + w)
    is original pixel (r*k + c, w).  `has_halo` adds two small neighbouring-row
    blocks used only for the tile-boundary row patches.
    """

    def body(w_ref, b_ref, xc_ref, xp_ref, xn_ref, o_ref):
        TR, Wp = o_ref.shape[-2], o_ref.shape[-1]
        # Sublane rolls only need sublane alignment; lane rolls kept on the
        # doubly-aligned (proven) layout - the fallback only hits tiny tiles.
        sub_fast = TR % 8 == 0
        lane_fast = (Wp % 128 == 0) and sub_fast

        def lroll(p, s):
            return _roll(p, s, 1, lane_fast)

        def sroll(p, s):
            return _roll(p, s, 0, sub_fast)

        # Nine weights + bias as SMEM scalars (hoisted once).
        w00, w01, w02 = w_ref[0], w_ref[1], w_ref[2]
        w10, w11, w12 = w_ref[3], w_ref[4], w_ref[5]
        w20, w21, w22 = w_ref[6], w_ref[7], w_ref[8]
        b = b_ref[0]

        c = xc_ref[0, 0, :, :].astype(jnp.float32)  # (TR, Wp)

        # ---- vertical neighbour planes --------------------------------------
        if k == 1:
            up = sroll(c, 1)    # wrong only on local row 0      (row patch below)
            dn = sroll(c, -1)   # wrong only on local row TR-1   (row patch below)
        else:
            lane = jax.lax.broadcasted_iota(jnp.int32, (1, Wp), 1)
            m_first = lane < W                 # lanes of the first packed block
            m_last = lane >= (k - 1) * W       # lanes of the last packed block
            up_wrap = lroll(c, W)
            dn_wrap = lroll(c, -W)
            up = jnp.where(m_first, sroll(up_wrap, 1), up_wrap)
            dn = jnp.where(m_last, sroll(dn_wrap, -1), dn_wrap)

        # ---- horizontal taps -------------------------------------------------
        if k == 1:
            def htaps(p):  # raw lane rolls; cols 0 / Wp-1 fixed by column patches
                return lroll(p, 1), lroll(p, -1)
        else:
            # Interior image edges every W lanes: fix with (1,Wp)-mask selects.
            lane = jax.lax.broadcasted_iota(jnp.int32, (1, Wp), 1)
            m_l = lane == 0
            m_r = lane == W - 1
            for cb in range(1, k):
                m_l = jnp.logical_or(m_l, lane == cb * W)
                m_r = jnp.logical_or(m_r, lane == cb * W + W - 1)

            def htaps(p):
                pm, pp = lroll(p, 1), lroll(p, -1)
                return jnp.where(m_l, pp, pm), jnp.where(m_r, pm, pp)

        # ---- bulk 9-tap accumulation (f32) -----------------------------------
        cl, cr = htaps(c)
        acc = w11 * c + w10 * cl + w12 * cr + b
        ul, ur = htaps(up)
        acc = acc + w01 * up + w00 * ul + w02 * ur
        dl, dr = htaps(dn)
        acc = acc + w21 * dn + w20 * dl + w22 * dr
        o_ref[0, 0, :, :] = acc.astype(o_ref.dtype)

        planes = ((up, w00, w01, w02), (c, w10, w11, w12), (dn, w20, w21, w22))

        # ---- k == 1: horizontal reflect via two narrow column patches ---------
        if k == 1:
            lcol = b
            rcol = b
            for (p, wl, wc, wr) in planes:
                lcol = lcol + (wl + wr) * p[:, 1:2] + wc * p[:, 0:1]
                rcol = rcol + (wl + wr) * p[:, Wp - 2:Wp - 1] + wc * p[:, Wp - 1:Wp]
            o_ref[0, 0, :, 0:1] = lcol.astype(o_ref.dtype)
            o_ref[0, 0, :, Wp - 1:Wp] = rcol.astype(o_ref.dtype)

        # ---- row patches: rows whose "up"/"down" neighbour is outside the tile
        # Row-0 patch covers lanes [0, W) of local row 0; last-row patch covers
        # lanes [(k-1)W, kW) of local row TR-1.  They are fully recomputed
        # (including horizontal reflect) and stored last, so they also repair the
        # corners touched by the patches above.
        def row_stencil(up_r, mid_r, dn_r):
            li = jax.lax.broadcasted_iota(jnp.int32, (1, W), 1)

            def h(p, wl, wc, wr):
                pm = jnp.roll(p, 1, axis=1)
                pp = jnp.roll(p, -1, axis=1)
                left = jnp.where(li == 0, pp, pm)
                right = jnp.where(li == W - 1, pm, pp)
                return wl * left + wc * p + wr * right

            return (h(up_r, w00, w01, w02) + h(mid_r, w10, w11, w12)
                    + h(dn_r, w20, w21, w22) + b)

        mid0 = c[0:1, 0:W]
        dn0 = c[0:1, W:2 * W] if k >= 2 else c[1:2, 0:W]
        mid1 = c[TR - 1:TR, (k - 1) * W:k * W]
        up1 = c[TR - 1:TR, (k - 2) * W:(k - 1) * W] if k >= 2 else c[TR - 2:TR - 1, 0:W]

        if has_halo:
            j = pl.program_id(1)
            nt = pl.num_programs(1)
            HB = xp_ref.shape[-2]
            prev_row = xp_ref[0, 0, HB - 1:HB, (k - 1) * W:k * W].astype(jnp.float32)
            next_row = xn_ref[0, 0, 0:1, 0:W].astype(jnp.float32)
            up0 = jnp.where(j == 0, dn0, prev_row)        # top reflect == row below
            dn1 = jnp.where(j == nt - 1, up1, next_row)   # bottom reflect == row above
        else:
            up0 = dn0
            dn1 = up1

        row0 = row_stencil(up0, mid0, dn0)
        row1 = row_stencil(up1, mid1, dn1)
        o_ref[0, 0, 0:1, 0:W] = row0.astype(o_ref.dtype)
        o_ref[0, 0, TR - 1:TR, (k - 1) * W:k * W] = row1.astype(o_ref.dtype)

    if has_halo:
        def kernel(w_ref, b_ref, xc_ref, xp_ref, xn_ref, o_ref):
            body(w_ref, b_ref, xc_ref, xp_ref, xn_ref, o_ref)
    else:
        def kernel(w_ref, b_ref, xc_ref, o_ref):
            body(w_ref, b_ref, xc_ref, None, None, o_ref)
    return kernel


def _vmem_capacity_bytes():
    try:
        info = pltpu.get_tpu_info()
    except Exception:
        return None
    for name in ("vmem_capacity_bytes", "vmem_size_bytes", "vmem_bytes"):
        val = getattr(info, name, None)
        if isinstance(val, (int, np.integer)) and val > 0:
            return int(val)
    return None


def _pick_pack_factor(H, W):
    """Rows of one image packed side-by-side along lanes (a free reshape)."""
    if W >= 128:
        return 1
    divs = [d for d in range(1, min(H, _MAX_PACK) + 1) if H % d == 0]
    for d in divs:                        # lane-dense (multiple of 128) preferred
        if d * W >= 128 and (d * W) % 128 == 0:
            return d
    for d in divs:                        # otherwise first k reaching >= 128 lanes
        if d * W >= 128:
            return d
    return divs[-1]                       # best effort: widest packed row available


def _pick_tile_rows(R, Wp, itemsize, budget_bytes, subg, prefer_split):
    row_bytes = Wp * itemsize
    divs = [t for t in range(subg, R, subg) if R % t == 0]  # proper, sublane-aligned
    fit = [t for t in divs if t * row_bytes <= budget_bytes]
    whole_fits = R * row_bytes <= budget_bytes
    if whole_fits and not (prefer_split and fit):
        return R
    if fit:
        return max(fit)
    if whole_fits:
        return R
    if divs:
        return min(divs)
    # TODO(synk): no sublane-aligned divisor (ragged H) -- one whole packed image
    # per grid step; very tall images could exceed the VMEM limit here.
    return R


def linearcnn_forward(x, weight, bias, *, pack_factor=None, tile_rows=None):
    """x: (N, 1, H, W); weight: (1, 1, 3, 3); bias: (1,).
    Matches nn.Conv2d(1, 1, 3, padding=1, padding_mode='reflect')."""
    N, C, H, W = x.shape
    assert C == 1
    assert H >= 2 and W >= 2, "reflect padding requires H >= 2 and W >= 2"

    itemsize = x.dtype.itemsize
    subg = 8 * max(1, 4 // itemsize)      # sublane granularity: f32 8, bf16 16, i8 32

    k = pack_factor if pack_factor is not None else _pick_pack_factor(H, W)
    assert H % k == 0, "pack_factor must divide H"
    R, Wp = H // k, k * W

    vmem_cap = _vmem_capacity_bytes()
    big_vmem = vmem_cap is not None and vmem_cap >= 100 * 1024 * 1024
    budget = 3 * 1024 * 1024 if big_vmem else (3 * 1024 * 1024) // 2
    vmem_limit = (64 if big_vmem else 32) * 1024 * 1024

    if tile_rows is not None:
        TR = tile_rows
    else:
        TR = _pick_tile_rows(R, Wp, itemsize, budget, subg, prefer_split=(N == 1))
    assert R % TR == 0, "tile_rows must divide the packed row count"
    NT = R // TR
    if NT > 1:
        assert TR % subg == 0, "row tiles must be sublane-aligned when tiled"

    xp = x.reshape(N, 1, R, Wp)           # free reshape: pack k rows along lanes
    w_flat = weight.reshape(K * K).astype(jnp.float32)
    b = bias.reshape(1).astype(jnp.float32)

    in_specs = [
        pl.BlockSpec(memory_space=pltpu.MemorySpace.SMEM),   # 3x3 weights
        pl.BlockSpec(memory_space=pltpu.MemorySpace.SMEM),   # bias
        pl.BlockSpec((1, 1, TR, Wp), lambda n, j: (n, 0, j, 0)),
    ]
    args = [w_flat, b, xp]
    if NT > 1:
        HB = subg
        RB = TR // HB
        NBH = R // HB
        # Small halo block just above the tile (clamped; unused when j == 0).
        in_specs.append(pl.BlockSpec(
            (1, 1, HB, Wp), lambda n, j: (n, 0, jnp.maximum(j * RB - 1, 0), 0)))
        # Small halo block just below the tile (clamped; unused when j == NT-1).
        in_specs.append(pl.BlockSpec(
            (1, 1, HB, Wp), lambda n, j: (n, 0, jnp.minimum((j + 1) * RB, NBH - 1), 0)))
        args += [xp, xp]

    halo_bytes = 0 if NT == 1 else 2 * N * NT * subg * Wp * itemsize
    out = pl.pallas_call(
        _make_kernel(k=k, W=W, has_halo=(NT > 1)),
        out_shape=jax.ShapeDtypeStruct((N, 1, R, Wp), x.dtype),
        grid_spec=pltpu.PrefetchScalarGridSpec(
            num_scalar_prefetch=0,
            grid=(N, NT),
            in_specs=in_specs,
            out_specs=pl.BlockSpec((1, 1, TR, Wp), lambda n, j: (n, 0, j, 0)),
        ),
        compiler_params=pltpu.CompilerParams(
            dimension_semantics=("parallel", "parallel"),
            vmem_limit_bytes=vmem_limit,
        ),
        cost_estimate=pl.CostEstimate(
            flops=2 * K * K * N * H * W,
            transcendentals=0,
            bytes_accessed=2 * N * H * W * itemsize + halo_bytes,
        ),
    )(*args)
    return out.reshape(N, 1, H, W)


def _reference(x, weight, bias):
    # Pure-JAX reference (reflect pad + explicit stencil).
    xpad = jnp.pad(x, ((0, 0), (0, 0), (PAD, PAD), (PAD, PAD)), mode="reflect")
    N, _, H, W = x.shape
    acc = jnp.zeros((N, 1, H, W), jnp.float32) + bias.astype(jnp.float32)[0]
    for di in range(K):
        for dj in range(K):
            acc = acc + weight[0, 0, di, dj] * xpad[:, :, di:di + H, dj:dj + W]
    return acc.astype(x.dtype)


if __name__ == "__main__":
    key = jax.random.PRNGKey(0)
    kx, kw, kb, kx2, kx3 = jax.random.split(key, 5)

    # Deterministic parameter init (shapes from nn.Conv2d(1, 1, 3)).
    fan_in = 1 * K * K
    bound = 1.0 / (fan_in ** 0.5)
    weight = jax.random.uniform(kw, (1, 1, K, K), jnp.float32, -bound, bound)
    bias = jax.random.uniform(kb, (1,), jnp.float32, -bound, bound)

    # 1) Module-consistent small input: N=2, C=1, 16x16 -> packed (2, 128),
    #    single tile per image, no halo inputs (lane-dense path).
    x = jax.random.normal(kx, (2, 1, 16, 16), jnp.float32)
    out = jax.block_until_ready(linearcnn_forward(x, weight, bias))
    ref = _reference(x, weight, bias)
    assert out.shape == (2, 1, 16, 16)
    assert jnp.allclose(out, ref, atol=1e-5, rtol=1e-5)

    # 2) Unpacked (k=1), lane-aligned, multi-row-tile path: exercises halo blocks,
    #    pltpu.roll on both axes and the narrow column/row patches.
    x2 = jax.random.normal(kx2, (2, 1, 32, 128), jnp.float32)
    out2 = jax.block_until_ready(linearcnn_forward(x2, weight, bias, tile_rows=8))
    ref2 = _reference(x2, weight, bias)
    assert jnp.allclose(out2, ref2, atol=1e-5, rtol=1e-5)

    # 3) Packed (k=4) + row-tiled + halos, N=1 so the grid still has 2 steps.
    x3 = jax.random.normal(kx3, (1, 1, 64, 32), jnp.float32)
    out3 = jax.block_until_ready(linearcnn_forward(x3, weight, bias))
    ref3 = _reference(x3, weight, bias)
    assert out3.shape == (1, 1, 64, 32)
    assert jnp.allclose(out3, ref3, atol=1e-5, rtol=1e-5)

    print("KERNEL_OK")
</pallas_src>

<mosaic_0001>
module attributes {stable_mosaic.version = 11 : i64} {
  func.func @kernel(%arg0: i32, %arg1: i32, %arg2: memref<9xf32, #tpu.memory_space<smem>>, %arg3: memref<1xf32, #tpu.memory_space<smem>>, %arg4: memref<1x1x2x128xf32, #tpu.memory_space<vmem>>, %arg5: memref<1x1x2x128xf32, #tpu.memory_space<vmem>>) attributes {dimension_semantics = [#tpu.dimension_semantics<parallel>, #tpu.dimension_semantics<parallel>], iteration_bounds = array<i64: 2, 1>, scalar_prefetch = 0 : i64, scratch_operands = 0 : i64, tpu.core_type = #tpu.core_type<tc>, window_params = [{transform_indices = @transform_0, window_bounds = array<i64: 9>}, {transform_indices = @transform_1, window_bounds = array<i64: 1>}, {transform_indices = @transform_2, window_bounds = array<i64: 1, 1, 2, 128>}, {transform_indices = @transform_3, window_bounds = array<i64: 1, 1, 2, 128>}]} {
    %c0 = arith.constant 0 : index
    %0 = memref.load %arg2[%c0] : memref<9xf32, #tpu.memory_space<smem>>
    %c1 = arith.constant 1 : index
    %1 = memref.load %arg2[%c1] : memref<9xf32, #tpu.memory_space<smem>>
    %c2 = arith.constant 2 : index
    %2 = memref.load %arg2[%c2] : memref<9xf32, #tpu.memory_space<smem>>
    %c3 = arith.constant 3 : index
    %3 = memref.load %arg2[%c3] : memref<9xf32, #tpu.memory_space<smem>>
    %c4 = arith.constant 4 : index
    %4 = memref.load %arg2[%c4] : memref<9xf32, #tpu.memory_space<smem>>
    %c5 = arith.constant 5 : index
    %5 = memref.load %arg2[%c5] : memref<9xf32, #tpu.memory_space<smem>>
    %c6 = arith.constant 6 : index
    %6 = memref.load %arg2[%c6] : memref<9xf32, #tpu.memory_space<smem>>
    %c7 = arith.constant 7 : index
    %7 = memref.load %arg2[%c7] : memref<9xf32, #tpu.memory_space<smem>>
    %c8 = arith.constant 8 : index
    %8 = memref.load %arg2[%c8] : memref<9xf32, #tpu.memory_space<smem>>
    %c0_0 = arith.constant 0 : index
    %9 = memref.load %arg3[%c0_0] : memref<1xf32, #tpu.memory_space<smem>>
    %c0_1 = arith.constant 0 : index
    %c0_2 = arith.constant 0 : index
    %c0_3 = arith.constant 0 : index
    %c0_4 = arith.constant 0 : index
    %10 = vector.load %arg4[%c0_1, %c0_2, %c0_3, %c0_4] : memref<1x1x2x128xf32, #tpu.memory_space<vmem>>, vector<1x1x2x128xf32>
    %11 = vector.shape_cast %10 : vector<1x1x2x128xf32> to vector<2x128xf32>
    %12 = tpu.iota {dimensions = array<i32: 1>} : vector<1x128xi32>
    %c16_i32 = arith.constant 16 : i32
    %13 = vector.broadcast %c16_i32 : i32 to vector<1x128xi32>
    %14 = arith.cmpi slt, %12, %13 : vector<1x128xi32>
    %c112_i32 = arith.constant 112 : i32
    %15 = vector.broadcast %c112_i32 : i32 to vector<1x128xi32>
    %16 = arith.cmpi sge, %12, %15 : vector<1x128xi32>
    %17 = vector.extract_strided_slice %11 {offsets = [0, 112], sizes = [2, 16], strides = [1, 1]} : vector<2x128xf32> to vector<2x16xf32>
    %18 = vector.extract_strided_slice %11 {offsets = [0, 0], sizes = [2, 112], strides = [1, 1]} : vector<2x128xf32> to vector<2x112xf32>
    %19 = tpu.concatenate %17, %18 in 1 : vector<2x16xf32>, vector<2x112xf32> -> vector<2x128xf32>
    %20 = vector.extract_strided_slice %11 {offsets = [0, 16], sizes = [2, 112], strides = [1, 1]} : vector<2x128xf32> to vector<2x112xf32>
    %21 = vector.extract_strided_slice %11 {offsets = [0, 0], sizes = [2, 16], strides = [1, 1]} : vector<2x128xf32> to vector<2x16xf32>
    %22 = tpu.concatenate %20, %21 in 1 : vector<2x112xf32>, vector<2x16xf32> -> vector<2x128xf32>
    %23 = vector.extract_strided_slice %19 {offsets = [1, 0], sizes = [1, 128], strides = [1, 1]} : vector<2x128xf32> to vector<1x128xf32>
    %24 = vector.extract_strided_slice %19 {offsets = [0, 0], sizes = [1, 128], strides = [1, 1]} : vector<2x128xf32> to vector<1x128xf32>
    %25 = tpu.concatenate %23, %24 in 0 : vector<1x128xf32>, vector<1x128xf32> -> vector<2x128xf32>
    %26 = vector.shape_cast %14 : vector<1x128xi1> to vector<1x128xi1>
    %27 = vector.broadcast %26 : vector<1x128xi1> to vector<2x128xi1>
    %28 = arith.select %27, %25, %19 : vector<2x128xi1>, vector<2x128xf32>
    %29 = vector.extract_strided_slice %22 {offsets = [1, 0], sizes = [1, 128], strides = [1, 1]} : vector<2x128xf32> to vector<1x128xf32>
    %30 = vector.extract_strided_slice %22 {offsets = [0, 0], sizes = [1, 128], strides = [1, 1]} : vector<2x128xf32> to vector<1x128xf32>
    %31 = tpu.concatenate %29, %30 in 0 : vector<1x128xf32>, vector<1x128xf32> -> vector<2x128xf32>
    %32 = vector.shape_cast %16 : vector<1x128xi1> to vector<1x128xi1>
    %33 = vector.broadcast %32 : vector<1x128xi1> to vector<2x128xi1>
    %34 = arith.select %33, %31, %22 : vector<2x128xi1>, vector<2x128xf32>
    %35 = tpu.iota {dimensions = array<i32: 1>} : vector<1x128xi32>
    %c0_i32 = arith.constant 0 : i32
    %36 = vector.broadcast %c0_i32 : i32 to vector<1x128xi32>
    %37 = arith.cmpi eq, %35, %36 : vector<1x128xi32>
    %c15_i32 = arith.constant 15 : i32
    %38 = vector.broadcast %c15_i32 : i32 to vector<1x128xi32>
    %39 = arith.cmpi eq, %35, %38 : vector<1x128xi32>
    %c16_i32_5 = arith.constant 16 : i32
    %40 = vector.broadcast %c16_i32_5 : i32 to vector<1x128xi32>
    %41 = arith.cmpi eq, %35, %40 : vector<1x128xi32>
    %42 = arith.ori %37, %41 : vector<1x128xi1>
    %c31_i32 = arith.constant 31 : i32
    %43 = vector.broadcast %c31_i32 : i32 to vector<1x128xi32>
    %44 = arith.cmpi eq, %35, %43 : vector<1x128xi32>
    %45 = arith.ori %39, %44 : vector<1x128xi1>
    %c32_i32 = arith.constant 32 : i32
    %46 = vector.broadcast %c32_i32 : i32 to vector<1x128xi32>
    %47 = arith.cmpi eq, %35, %46 : vector<1x128xi32>
    %48 = arith.ori %42, %47 : vector<1x128xi1>
    %c47_i32 = arith.constant 47 : i32
    %49 = vector.broadcast %c47_i32 : i32 to vector<1x128xi32>
    %50 = arith.cmpi eq, %35, %49 : vector<1x128xi32>
    %51 = arith.ori %45, %50 : vector<1x128xi1>
    %c48_i32 = arith.constant 48 : i32
    %52 = vector.broadcast %c48_i32 : i32 to vector<1x128xi32>
    %53 = arith.cmpi eq, %35, %52 : vector<1x128xi32>
    %54 = arith.ori %48, %53 : vector<1x128xi1>
    %c63_i32 = arith.constant 63 : i32
    %55 = vector.broadcast %c63_i32 : i32 to vector<1x128xi32>
    %56 = arith.cmpi eq, %35, %55 : vector<1x128xi32>
    %57 = arith.ori %51, %56 : vector<1x128xi1>
    %c64_i32 = arith.constant 64 : i32
    %58 = vector.broadcast %c64_i32 : i32 to vector<1x128xi32>
    %59 = arith.cmpi eq, %35, %58 : vector<1x128xi32>
    %60 = arith.ori %54, %59 : vector<1x128xi1>
    %c79_i32 = arith.constant 79 : i32
    %61 = vector.broadcast %c79_i32 : i32 to vector<1x128xi32>
    %62 = arith.cmpi eq, %35, %61 : vector<1x128xi32>
    %63 = arith.ori %57, %62 : vector<1x128xi1>
    %c80_i32 = arith.constant 80 : i32
    %64 = vector.broadcast %c80_i32 : i32 to vector<1x128xi32>
    %65 = arith.cmpi eq, %35, %64 : vector<1x128xi32>
    %66 = arith.ori %60, %65 : vector<1x128xi1>
    %c95_i32 = arith.constant 95 : i32
    %67 = vector.broadcast %c95_i32 : i32 to vector<1x128xi32>
    %68 = arith.cmpi eq, %35, %67 : vector<1x128xi32>
    %69 = arith.ori %63, %68 : vector<1x128xi1>
    %c96_i32 = arith.constant 96 : i32
    %70 = vector.broadcast %c96_i32 : i32 to vector<1x128xi32>
    %71 = arith.cmpi eq, %35, %70 : vector<1x128xi32>
    %72 = arith.ori %66, %71 : vector<1x128xi1>
    %c111_i32 = arith.constant 111 : i32
    %73 = vector.broadcast %c111_i32 : i32 to vector<1x128xi32>
    %74 = arith.cmpi eq, %35, %73 : vector<1x128xi32>
    %75 = arith.ori %69, %74 : vector<1x128xi1>
    %c112_i32_6 = arith.constant 112 : i32
    %76 = vector.broadcast %c112_i32_6 : i32 to vector<1x128xi32>
    %77 = arith.cmpi eq, %35, %76 : vector<1x128xi32>
    %78 = arith.ori %72, %77 : vector<1x128xi1>
    %c127_i32 = arith.constant 127 : i32
    %79 = vector.broadcast %c127_i32 : i32 to vector<1x128xi32>
    %80 = arith.cmpi eq, %35, %79 : vector<1x128xi32>
    %81 = arith.ori %75, %80 : vector<1x128xi1>
    %82 = vector.extract_strided_slice %11 {offsets = [0, 127], sizes = [2, 1], strides = [1, 1]} : vector<2x128xf32> to vector<2x1xf32>
    %83 = vector.extract_strided_slice %11 {offsets = [0, 0], sizes = [2, 127], strides = [1, 1]} : vector<2x128xf32> to vector<2x127xf32>
    %84 = tpu.concatenate %82, %83 in 1 : vector<2x1xf32>, vector<2x127xf32> -> vector<2x128xf32>
    %85 = vector.extract_strided_slice %11 {offsets = [0, 1], sizes = [2, 127], strides = [1, 1]} : vector<2x128xf32> to vector<2x127xf32>
    %86 = vector.extract_strided_slice %11 {offsets = [0, 0], sizes = [2, 1], strides = [1, 1]} : vector<2x128xf32> to vector<2x1xf32>
    %87 = tpu.concatenate %85, %86 in 1 : vector<2x127xf32>, vector<2x1xf32> -> vector<2x128xf32>
    %88 = vector.shape_cast %78 : vector<1x128xi1> to vector<1x128xi1>
    %89 = vector.broadcast %88 : vector<1x128xi1> to vector<2x128xi1>
    %90 = arith.select %89, %87, %84 : vector<2x128xi1>, vector<2x128xf32>
    %91 = vector.shape_cast %81 : vector<1x128xi1> to vector<1x128xi1>
    %92 = vector.broadcast %91 : vector<1x128xi1> to vector<2x128xi1>
    %93 = arith.select %92, %84, %87 : vector<2x128xi1>, vector<2x128xf32>
    %94 = vector.broadcast %4 : f32 to vector<2x128xf32>
    %95 = arith.mulf %94, %11 : vector<2x128xf32>
    %96 = vector.broadcast %3 : f32 to vector<2x128xf32>
    %97 = arith.mulf %96, %90 : vector<2x128xf32>
    %98 = arith.addf %95, %97 : vector<2x128xf32>
    %99 = vector.broadcast %5 : f32 to vector<2x128xf32>
    %100 = arith.mulf %99, %93 : vector<2x128xf32>
    %101 = arith.addf %98, %100 : vector<2x128xf32>
    %102 = vector.broadcast %9 : f32 to vector<2x128xf32>
    %103 = arith.addf %101, %102 : vector<2x128xf32>
    %104 = vector.extract_strided_slice %28 {offsets = [0, 127], sizes = [2, 1], strides = [1, 1]} : vector<2x128xf32> to vector<2x1xf32>
    %105 = vector.extract_strided_slice %28 {offsets = [0, 0], sizes = [2, 127], strides = [1, 1]} : vector<2x128xf32> to vector<2x127xf32>
    %106 = tpu.concatenate %104, %105 in 1 : vector<2x1xf32>, vector<2x127xf32> -> vector<2x128xf32>
    %107 = vector.extract_strided_slice %28 {offsets = [0, 1], sizes = [2, 127], strides = [1, 1]} : vector<2x128xf32> to vector<2x127xf32>
    %108 = vector.extract_strided_slice %28 {offsets = [0, 0], sizes = [2, 1], strides = [1, 1]} : vector<2x128xf32> to vector<2x1xf32>
    %109 = tpu.concatenate %107, %108 in 1 : vector<2x127xf32>, vector<2x1xf32> -> vector<2x128xf32>
    %110 = vector.shape_cast %78 : vector<1x128xi1> to vector<1x128xi1>
    %111 = vector.broadcast %110 : vector<1x128xi1> to vector<2x128xi1>
    %112 = arith.select %111, %109, %106 : vector<2x128xi1>, vector<2x128xf32>
    %113 = vector.shape_cast %81 : vector<1x128xi1> to vector<1x128xi1>
    %114 = vector.broadcast %113 : vector<1x128xi1> to vector<2x128xi1>
    %115 = arith.select %114, %106, %109 : vector<2x128xi1>, vector<2x128xf32>
    %116 = vector.broadcast %1 : f32 to vector<2x128xf32>
    %117 = arith.mulf %116, %28 : vector<2x128xf32>
    %118 = arith.addf %103, %117 : vector<2x128xf32>
    %119 = vector.broadcast %0 : f32 to vector<2x128xf32>
    %120 = arith.mulf %119, %112 : vector<2x128xf32>
    %121 = arith.addf %118, %120 : vector<2x128xf32>
    %122 = vector.broadcast %2 : f32 to vector<2x128xf32>
    %123 = arith.mulf %122, %115 : vector<2x128xf32>
    %124 = arith.addf %121, %123 : vector<2x128xf32>
    %125 = vector.extract_strided_slice %34 {offsets = [0, 127], sizes = [2, 1], strides = [1, 1]} : vector<2x128xf32> to vector<2x1xf32>
    %126 = vector.extract_strided_slice %34 {offsets = [0, 0], sizes = [2, 127], strides = [1, 1]} : vector<2x128xf32> to vector<2x127xf32>
    %127 = tpu.concatenate %125, %126 in 1 : vector<2x1xf32>, vector<2x127xf32> -> vector<2x128xf32>
    %128 = vector.extract_strided_slice %34 {offsets = [0, 1], sizes = [2, 127], strides = [1, 1]} : vector<2x128xf32> to vector<2x127xf32>
    %129 = vector.extract_strided_slice %34 {offsets = [0, 0], sizes = [2, 1], strides = [1, 1]} : vector<2x128xf32> to vector<2x1xf32>
    %130 = tpu.concatenate %128, %129 in 1 : vector<2x127xf32>, vector<2x1xf32> -> vector<2x128xf32>
    %131 = vector.shape_cast %78 : vector<1x128xi1> to vector<1x128xi1>
    %132 = vector.broadcast %131 : vector<1x128xi1> to vector<2x128xi1>
    %133 = arith.select %132, %130, %127 : vector<2x128xi1>, vector<2x128xf32>
    %134 = vector.shape_cast %81 : vector<1x128xi1> to vector<1x128xi1>
    %135 = vector.broadcast %134 : vector<1x128xi1> to vector<2x128xi1>
    %136 = arith.select %135, %127, %130 : vector<2x128xi1>, vector<2x128xf32>
    %137 = vector.broadcast %7 : f32 to vector<2x128xf32>
    %138 = arith.mulf %137, %34 : vector<2x128xf32>
    %139 = arith.addf %124, %138 : vector<2x128xf32>
    %140 = vector.broadcast %6 : f32 to vector<2x128xf32>
    %141 = arith.mulf %140, %133 : vector<2x128xf32>
    %142 = arith.addf %139, %141 : vector<2x128xf32>
    %143 = vector.broadcast %8 : f32 to vector<2x128xf32>
    %144 = arith.mulf %143, %136 : vector<2x128xf32>
    %145 = arith.addf %142, %144 : vector<2x128xf32>
    %c0_7 = arith.constant 0 : index
    %c0_8 = arith.constant 0 : index
    %c0_9 = arith.constant 0 : index
    %c0_10 = arith.constant 0 : index
    %146 = vector.load %arg5[%c0_7, %c0_8, %c0_9, %c0_10] : memref<1x1x2x128xf32, #tpu.memory_space<vmem>>, vector<1x1x2x128xf32>
    %147 = vector.shape_cast %146 : vector<1x1x2x128xf32> to vector<2x128xf32>
    %148 = vector.shape_cast %145 : vector<2x128xf32> to vector<1x1x2x128xf32>
    tpu.vector_store %arg5[%c0_7, %c0_8, %c0_9, %c0_10], %148 {strides = array<i32>} : memref<1x1x2x128xf32, #tpu.memory_space<vmem>>, vector<1x1x2x128xf32>,
    %149 = vector.extract_strided_slice %11 {offsets = [0, 0], sizes = [1, 16], strides = [1, 1]} : vector<2x128xf32> to vector<1x16xf32>
    %150 = vector.extract_strided_slice %11 {offsets = [0, 16], sizes = [1, 16], strides = [1, 1]} : vector<2x128xf32> to vector<1x16xf32>
    %151 = vector.extract_strided_slice %11 {offsets = [1, 112], sizes = [1, 16], strides = [1, 1]} : vector<2x128xf32> to vector<1x16xf32>
    %152 = vector.extract_strided_slice %11 {offsets = [1, 96], sizes = [1, 16], strides = [1, 1]} : vector<2x128xf32> to vector<1x16xf32>
    %153 = tpu.iota {dimensions = array<i32: 1>} : vector<1x16xi32>
    %154 = vector.extract_strided_slice %150 {offsets = [0, 15], sizes = [1, 1], strides = [1, 1]} : vector<1x16xf32> to vector<1x1xf32>
    %155 = vector.extract_strided_slice %150 {offsets = [0, 0], sizes = [1, 15], strides = [1, 1]} : vector<1x16xf32> to vector<1x15xf32>
    %156 = tpu.concatenate %154, %155 in 1 : vector<1x1xf32>, vector<1x15xf32> -> vector<1x16xf32>
    %157 = vector.extract_strided_slice %150 {offsets = [0, 1], sizes = [1, 15], strides = [1, 1]} : vector<1x16xf32> to vector<1x15xf32>
    %158 = vector.extract_strided_slice %150 {offsets = [0, 0], sizes = [1, 1], strides = [1, 1]} : vector<1x16xf32> to vector<1x1xf32>
    %159 = tpu.concatenate %157, %158 in 1 : vector<1x15xf32>, vector<1x1xf32> -> vector<1x16xf32>
    %c0_i32_11 = arith.constant 0 : i32
    %160 = vector.broadcast %c0_i32_11 : i32 to vector<1x16xi32>
    %161 = arith.cmpi eq, %153, %160 : vector<1x16xi32>
    %162 = arith.select %161, %159, %156 : vector<1x16xi1>, vector<1x16xf32>
    %c15_i32_12 = arith.constant 15 : i32
    %163 = vector.broadcast %c15_i32_12 : i32 to vector<1x16xi32>
    %164 = arith.cmpi eq, %153, %163 : vector<1x16xi32>
    %165 = arith.select %164, %156, %159 : vector<1x16xi1>, vector<1x16xf32>
    %166 = vector.broadcast %0 : f32 to vector<1x16xf32>
    %167 = arith.mulf %166, %162 : vector<1x16xf32>
    %168 = vector.broadcast %1 : f32 to vector<1x16xf32>
    %169 = arith.mulf %168, %150 : vector<1x16xf32>
    %170 = arith.addf %167, %169 : vector<1x16xf32>
    %171 = vector.broadcast %2 : f32 to vector<1x16xf32>
    %172 = arith.mulf %171, %165 : vector<1x16xf32>
    %173 = arith.addf %170, %172 : vector<1x16xf32>
    %174 = vector.extract_strided_slice %149 {offsets = [0, 15], sizes = [1, 1], strides = [1, 1]} : vector<1x16xf32> to vector<1x1xf32>
    %175 = vector.extract_strided_slice %149 {offsets = [0, 0], sizes = [1, 15], strides = [1, 1]} : vector<1x16xf32> to vector<1x15xf32>
    %176 = tpu.concatenate %174, %175 in 1 : vector<1x1xf32>, vector<1x15xf32> -> vector<1x16xf32>
    %177 = vector.extract_strided_slice %149 {offsets = [0, 1], sizes = [1, 15], strides = [1, 1]} : vector<1x16xf32> to vector<1x15xf32>
    %178 = vector.extract_strided_slice %149 {offsets = [0, 0], sizes = [1, 1], strides = [1, 1]} : vector<1x16xf32> to vector<1x1xf32>
    %179 = tpu.concatenate %177, %178 in 1 : vector<1x15xf32>, vector<1x1xf32> -> vector<1x16xf32>
    %c0_i32_13 = arith.constant 0 : i32
    %180 = vector.broadcast %c0_i32_13 : i32 to vector<1x16xi32>
    %181 = arith.cmpi eq, %153, %180 : vector<1x16xi32>
    %182 = arith.select %181, %179, %176 : vector<1x16xi1>, vector<1x16xf32>
    %c15_i32_14 = arith.constant 15 : i32
    %183 = vector.broadcast %c15_i32_14 : i32 to vector<1x16xi32>
    %184 = arith.cmpi eq, %153, %183 : vector<1x16xi32>
    %185 = arith.select %184, %176, %179 : vector<1x16xi1>, vector<1x16xf32>
    %186 = vector.broadcast %3 : f32 to vector<1x16xf32>
    %187 = arith.mulf %186, %182 : vector<1x16xf32>
    %188 = vector.broadcast %4 : f32 to vector<1x16xf32>
    %189 = arith.mulf %188, %149 : vector<1x16xf32>
    %190 = arith.addf %187, %189 : vector<1x16xf32>
    %191 = vector.broadcast %5 : f32 to vector<1x16xf32>
    %192 = arith.mulf %191, %185 : vector<1x16xf32>
    %193 = arith.addf %190, %192 : vector<1x16xf32>
    %194 = arith.addf %173, %193 : vector<1x16xf32>
    %195 = vector.extract_strided_slice %150 {offsets = [0, 15], sizes = [1, 1], strides = [1, 1]} : vector<1x16xf32> to vector<1x1xf32>
    %196 = vector.extract_strided_slice %150 {offsets = [0, 0], sizes = [1, 15], strides = [1, 1]} : vector<1x16xf32> to vector<1x15xf32>
    %197 = tpu.concatenate %195, %196 in 1 : vector<1x1xf32>, vector<1x15xf32> -> vector<1x16xf32>
    %198 = vector.extract_strided_slice %150 {offsets = [0, 1], sizes = [1, 15], strides = [1, 1]} : vector<1x16xf32> to vector<1x15xf32>
    %199 = vector.extract_strided_slice %150 {offsets = [0, 0], sizes = [1, 1], strides = [1, 1]} : vector<1x16xf32> to vector<1x1xf32>
    %200 = tpu.concatenate %198, %199 in 1 : vector<1x15xf32>, vector<1x1xf32> -> vector<1x16xf32>
    %c0_i32_15 = arith.constant 0 : i32
    %201 = vector.broadcast %c0_i32_15 : i32 to vector<1x16xi32>
    %202 = arith.cmpi eq, %153, %201 : vector<1x16xi32>
    %203 = arith.select %202, %200, %197 : vector<1x16xi1>, vector<1x16xf32>
    %c15_i32_16 = arith.constant 15 : i32
    %204 = vector.broadcast %c15_i32_16 : i32 to vector<1x16xi32>
    %205 = arith.cmpi eq, %153, %204 : vector<1x16xi32>
    %206 = arith.select %205, %197, %200 : vector<1x16xi1>, vector<1x16xf32>
    %207 = vector.broadcast %6 : f32 to vector<1x16xf32>
    %208 = arith.mulf %207, %203 : vector<1x16xf32>
    %209 = vector.broadcast %7 : f32 to vector<1x16xf32>
    %210 = arith.mulf %209, %150 : vector<1x16xf32>
    %211 = arith.addf %208, %210 : vector<1x16xf32>
    %212 = vector.broadcast %8 : f32 to vector<1x16xf32>
    %213 = arith.mulf %212, %206 : vector<1x16xf32>
    %214 = arith.addf %211, %213 : vector<1x16xf32>
    %215 = arith.addf %194, %214 : vector<1x16xf32>
    %216 = vector.broadcast %9 : f32 to vector<1x16xf32>
    %217 = arith.addf %215, %216 : vector<1x16xf32>
    %218 = tpu.iota {dimensions = array<i32: 1>} : vector<1x16xi32>
    %219 = vector.extract_strided_slice %152 {offsets = [0, 15], sizes = [1, 1], strides = [1, 1]} : vector<1x16xf32> to vector<1x1xf32>
    %220 = vector.extract_strided_slice %152 {offsets = [0, 0], sizes = [1, 15], strides = [1, 1]} : vector<1x16xf32> to vector<1x15xf32>
    %221 = tpu.concatenate %219, %220 in 1 : vector<1x1xf32>, vector<1x15xf32> -> vector<1x16xf32>
    %222 = vector.extract_strided_slice %152 {offsets = [0, 1], sizes = [1, 15], strides = [1, 1]} : vector<1x16xf32> to vector<1x15xf32>
    %223 = vector.extract_strided_slice %152 {offsets = [0, 0], sizes = [1, 1], strides = [1, 1]} : vector<1x16xf32> to vector<1x1xf32>
    %224 = tpu.concatenate %222, %223 in 1 : vector<1x15xf32>, vector<1x1xf32> -> vector<1x16xf32>
    %c0_i32_17 = arith.constant 0 : i32
    %225 = vector.broadcast %c0_i32_17 : i32 to vector<1x16xi32>
    %226 = arith.cmpi eq, %218, %225 : vector<1x16xi32>
    %227 = arith.select %226, %224, %221 : vector<1x16xi1>, vector<1x16xf32>
    %c15_i32_18 = arith.constant 15 : i32
    %228 = vector.broadcast %c15_i32_18 : i32 to vector<1x16xi32>
    %229 = arith.cmpi eq, %218, %228 : vector<1x16xi32>
    %230 = arith.select %229, %221, %224 : vector<1x16xi1>, vector<1x16xf32>
    %231 = vector.broadcast %0 : f32 to vector<1x16xf32>
    %232 = arith.mulf %231, %227 : vector<1x16xf32>
    %233 = vector.broadcast %1 : f32 to vector<1x16xf32>
    %234 = arith.mulf %233, %152 : vector<1x16xf32>
    %235 = arith.addf %232, %234 : vector<1x16xf32>
    %236 = vector.broadcast %2 : f32 to vector<1x16xf32>
    %237 = arith.mulf %236, %230 : vector<1x16xf32>
    %238 = arith.addf %235, %237 : vector<1x16xf32>
    %239 = vector.extract_strided_slice %151 {offsets = [0, 15], sizes = [1, 1], strides = [1, 1]} : vector<1x16xf32> to vector<1x1xf32>
    %240 = vector.extract_strided_slice %151 {offsets = [0, 0], sizes = [1, 15], strides = [1, 1]} : vector<1x16xf32> to vector<1x15xf32>
    %241 = tpu.concatenate %239, %240 in 1 : vector<1x1xf32>, vector<1x15xf32> -> vector<1x16xf32>
    %242 = vector.extract_strided_slice %151 {offsets = [0, 1], sizes = [1, 15], strides = [1, 1]} : vector<1x16xf32> to vector<1x15xf32>
    %243 = vector.extract_strided_slice %151 {offsets = [0, 0], sizes = [1, 1], strides = [1, 1]} : vector<1x16xf32> to vector<1x1xf32>
    %244 = tpu.concatenate %242, %243 in 1 : vector<1x15xf32>, vector<1x1xf32> -> vector<1x16xf32>
    %c0_i32_19 = arith.constant 0 : i32
    %245 = vector.broadcast %c0_i32_19 : i32 to vector<1x16xi32>
    %246 = arith.cmpi eq, %218, %245 : vector<1x16xi32>
    %247 = arith.select %246, %244, %241 : vector<1x16xi1>, vector<1x16xf32>
    %c15_i32_20 = arith.constant 15 : i32
    %248 = vector.broadcast %c15_i32_20 : i32 to vector<1x16xi32>
    %249 = arith.cmpi eq, %218, %248 : vector<1x16xi32>
    %250 = arith.select %249, %241, %244 : vector<1x16xi1>, vector<1x16xf32>
    %251 = vector.broadcast %3 : f32 to vector<1x16xf32>
    %252 = arith.mulf %251, %247 : vector<1x16xf32>
    %253 = vector.broadcast %4 : f32 to vector<1x16xf32>
    %254 = arith.mulf %253, %151 : vector<1x16xf32>
    %255 = arith.addf %252, %254 : vector<1x16xf32>
    %256 = vector.broadcast %5 : f32 to vector<1x16xf32>
    %257 = arith.mulf %256, %250 : vector<1x16xf32>
    %258 = arith.addf %255, %257 : vector<1x16xf32>
    %259 = arith.addf %238, %258 : vector<1x16xf32>
    %260 = vector.extract_strided_slice %152 {offsets = [0, 15], sizes = [1, 1], strides = [1, 1]} : vector<1x16xf32> to vector<1x1xf32>
    %261 = vector.extract_strided_slice %152 {offsets = [0, 0], sizes = [1, 15], strides = [1, 1]} : vector<1x16xf32> to vector<1x15xf32>
    %262 = tpu.concatenate %260, %261 in 1 : vector<1x1xf32>, vector<1x15xf32> -> vector<1x16xf32>
    %263 = vector.extract_strided_slice %152 {offsets = [0, 1], sizes = [1, 15], strides = [1, 1]} : vector<1x16xf32> to vector<1x15xf32>
    %264 = vector.extract_strided_slice %152 {offsets = [0, 0], sizes = [1, 1], strides = [1, 1]} : vector<1x16xf32> to vector<1x1xf32>
    %265 = tpu.concatenate %263, %264 in 1 : vector<1x15xf32>, vector<1x1xf32> -> vector<1x16xf32>
    %c0_i32_21 = arith.constant 0 : i32
    %266 = vector.broadcast %c0_i32_21 : i32 to vector<1x16xi32>
    %267 = arith.cmpi eq, %218, %266 : vector<1x16xi32>
    %268 = arith.select %267, %265, %262 : vector<1x16xi1>, vector<1x16xf32>
    %c15_i32_22 = arith.constant 15 : i32
    %269 = vector.broadcast %c15_i32_22 : i32 to vector<1x16xi32>
    %270 = arith.cmpi eq, %218, %269 : vector<1x16xi32>
    %271 = arith.select %270, %262, %265 : vector<1x16xi1>, vector<1x16xf32>
    %272 = vector.broadcast %6 : f32 to vector<1x16xf32>
    %273 = arith.mulf %272, %268 : vector<1x16xf32>
    %274 = vector.broadcast %7 : f32 to vector<1x16xf32>
    %275 = arith.mulf %274, %152 : vector<1x16xf32>
    %276 = arith.addf %273, %275 : vector<1x16xf32>
    %277 = vector.broadcast %8 : f32 to vector<1x16xf32>
    %278 = arith.mulf %277, %271 : vector<1x16xf32>
    %279 = arith.addf %276, %278 : vector<1x16xf32>
    %280 = arith.addf %259, %279 : vector<1x16xf32>
    %281 = vector.broadcast %9 : f32 to vector<1x16xf32>
    %282 = arith.addf %280, %281 : vector<1x16xf32>
    %c0_23 = arith.constant 0 : index
    %c0_24 = arith.constant 0 : index
    %c0_25 = arith.constant 0 : index
    %c0_26 = arith.constant 0 : index
    %283 = vector.load %arg5[%c0_23, %c0_24, %c0_25, %c0_26] : memref<1x1x2x128xf32, #tpu.memory_space<vmem>>, vector<1x1x1x16xf32>
    %284 = vector.shape_cast %283 : vector<1x1x1x16xf32> to vector<1x16xf32>
    %285 = vector.shape_cast %217 : vector<1x16xf32> to vector<1x1x1x16xf32>
    tpu.vector_store %arg5[%c0_23, %c0_24, %c0_25, %c0_26], %285 {strides = array<i32>} : memref<1x1x2x128xf32, #tpu.memory_space<vmem>>, vector<1x1x1x16xf32>,
    %c0_27 = arith.constant 0 : index
    %c0_28 = arith.constant 0 : index
    %c1_29 = arith.constant 1 : index
    %c112 = arith.constant 112 : index
    %286 = vector.load %arg5[%c0_27, %c0_28, %c1_29, %c112] : memref<1x1x2x128xf32, #tpu.memory_space<vmem>>, vector<1x1x1x16xf32>
    %287 = vector.shape_cast %286 : vector<1x1x1x16xf32> to vector<1x16xf32>
    %288 = vector.shape_cast %282 : vector<1x16xf32> to vector<1x1x1x16xf32>
    tpu.vector_store %arg5[%c0_27, %c0_28, %c1_29, %c112], %288 {strides = array<i32>} : memref<1x1x2x128xf32, #tpu.memory_space<vmem>>, vector<1x1x1x16xf32>,
    return
  }
  func.func @transform_0(%arg0: i32, %arg1: i32) -> i32 {
    %c0_i32 = arith.constant 0 : i32
    %c0_i32_0 = arith.constant 0 : i32
    return %c0_i32 : i32
  }
  func.func @transform_1(%arg0: i32, %arg1: i32) -> i32 {
    %c0_i32 = arith.constant 0 : i32
    %c0_i32_0 = arith.constant 0 : i32
    return %c0_i32 : i32
  }
  func.func @transform_2(%arg0: i32, %arg1: i32) -> (i32, i32, i32, i32) {
    %c0_i32 = arith.constant 0 : i32
    %c0_i32_0 = arith.constant 0 : i32
    %c0_i32_1 = arith.constant 0 : i32
    return %arg0, %c0_i32, %arg1, %c0_i32_0 : i32, i32, i32, i32
  }
  func.func @transform_3(%arg0: i32, %arg1: i32) -> (i32, i32, i32, i32) {
    %c0_i32 = arith.constant 0 : i32
    %c0_i32_0 = arith.constant 0 : i32
    %c0_i32_1 = arith.constant 0 : i32
    return %arg0, %c0_i32, %arg1, %c0_i32_0 : i32, i32, i32, i32
  }
}

</mosaic_0001>

<bundles_post_ra>
// kernel: tpu_custom_call.1
= control target key start
LH: loop header
LB: loop body
LE: loop exit
PB: predicated region body
PF: predicated region fallthrough
CT: control target
= control target key end

     0   :  { %s1065_s0 = inlined_call_operand.vmem [shape: f32[9], index: 0, kind: input, shape index: {}]   ;;  %s1066_s1 = inlined_call_operand.<no memory space> [shape: f32[1], index: 1, kind: input, shape index: {}]   ;;  %s1067_s2 = inlined_call_operand.vmem [shape: f32[2,1,2,128], index: 2, kind: input, shape index: {}]   ;;  %s1068_s3 = inlined_call_operand.hbm [shape: f32[2,1,2,128], index: 3, kind: output, shape index: {}]  }
   0x1   :  { %8 = sst [smem:[#allocation2]] %s1066_s1 }
   0x2   :  { %9 = vsyncpa [#allocation5], 0 }
   0x3   :  { %10 = vsyncpa [#allocation4], 0 }
   0x4   :  { %12 = vsyncpa [#allocation4 + $0x1], 0  ;;  %s773_s14 = smov 0   ;;  %s775_s15 = smov 0  }
   0x5   :  { %s777_s16 = smov 0   ;;  %s779_s17 = smov 0  }
   0x6   :  { %s781_s18 = smov 0   ;;  %s783_s19 = smov 0  }
   0x7 LB: > { %s534_s1 = sadd.s32 4294967295, %s732_s19   ;;  %s535_s20 = sadd.s32 4294967294, %s732_s19   ;;  %s732_s19 = sphi %s783_s19, %s18_s19   ;;  %s728_s18 = sphi %s781_s18, %s1079_s18   ;;  %s724_s17 = sphi %s779_s17, %s1078_s17   ;;  %s720_s16 = sphi %s777_s16, %s1077_s16   ;;  %s716_s15 = sphi %s775_s15, %s1076_s15   ;;  %s712_s14 = sphi %s773_s14, %s1075_s14  }
   0x8   : > { %s30_s21 = sadd.s32 1, %s728_s18  ;;  %s109_s22 = sadd.s32 1, %s720_s16 }
   0x9   : > { %p32_p0 = scmp.ge.s32.totalorder %s30_s21, 2  ;;  %p119_p1 = scmp.ne.s32.totalorder %s720_s16, %s716_s15 }
   0xa   : > { %p120_p2 = scmp.eq.s32.totalorder %s534_s1, 1  ;;  %p125_p3 = scmp.ne.s32.totalorder %s716_s15, %s712_s14 }
   0xb   : > { %s1081_s21 = smov (%p32_p0, %s30_s21), 0  ;;  %p126_p5 = scmp.eq.s32.totalorder %s535_s20, 1 }
   0xc   : > { %p813_p4 = por %p120_p2, %p119_p1  ;;  %s104_s24 = ssub.s32 %s728_s18, %s1081_s21 }
   0xd   : > { %p536_p6 = scmp.ge.s32.totalorder %s732_s19, 1  ;;  %p107_p7 = scmp.eq.s32.totalorder %s104_s24, 0 }
   0xe   : > { %p820_p8 = por %p126_p5, %p125_p3  ;;  %p133_p9 = scmp.lt.s32.totalorder %s732_s19, 3 }
   0xf   : > { %s826_s26 = scalar_select %p107_p7, %s720_s16, %s109_s22  }
  0x10   : > { %p828_p10 = pnand %p536_p6, %p133_p9  ;;  %p832_p11 = scmp.eq.s32.totalorder %s534_s1, 0 }
  0x11   : > { %s146_s4 = sshll.u32 %s1065_s0, 4  ;;  %s147_s4 = int_to_ptr.vmem [resolvable:$true] %s146_s4 }
  0x12   : > { %p561_p12 = pneg %p828_p10  ;;  %s635_s5 = scalar_lea.vmem %s147_s4, 16 }
  0x13   : > { %p636_p0 = scmp.ne.s32.totalorder %s147_s4, %s635_s5  ;;  %p643_p5 = scmp.lt.s32.totalorder %s147_s4, %s147_s4 }
  0x14   : > { %p562_p13 = pnand %p832_p11, %p561_p12  ;;  %p644_p6 = scmp.lt.s32.totalorder %s635_s5, %s635_s5 }
  0x16   : > { %p637_p1 = pneg %p562_p13  ;;  %p645_p7 = por %p644_p6, %p643_p5 }
  0x18   : > { %p638_p2 = pnand %p637_p1, %p636_p0 }
  0x1a   : > { %p639_p3 = pneg %p638_p2 }
  0x1c   : > { %p646_p9 = pnand %p645_p7, %p639_p3 }
  0x1e   : > { %649 = shalt.err (!%p646_p9)
}
  0x1f   : > { %s734_s6 = smov [#allocation3]   ;;  %172 = sbr.rel (%p828_p10) target bundleno = 321 (0x141), region = 32 }
  0x20   : > { %564 = dma.vmem_to_smem (!%p562_p13), %s147_s4, 16, %s734_s6, [#allocation5]  }
  0x26   : > { %703 = dma.done.wait (%p832_p11), [#allocation5], 16  }
  0x27   : > { %705 = vsyncadd (%p832_p11), [#allocation5], 4294967280 }
  0x28   : > { %178 = sfence }
  0x29   : > { %p199_p12 = scmp.lt.s32.totalorder %s724_s17, 1  ;;  %s735_s12 = smov 15   ;;  %v217_v7 = vlaneseq  ;;  %vm233_vm12 = vcmask 1040384   ;;  %v748_v39 = vmov 0  }
  0x2a   : > { %s736_s13 = smov 16   ;;  %s854_s1 = sld [smem:[#allocation3 + $0x1]] }
  0x2b   : > { %s200_s7 = scalar_select %p199_p12, %s724_s17, 1  ;;  %v876_v8 = vand.u32 127, %v217_v7 }
  0x2c   : > { %s546_s20 = sld [smem:[#allocation3 + $0x4]]  ;;  %s737_s22 = smov 17  }
  0x2d   : > { %s542_s8 = sshll.u32 %s200_s7, 1  ;;  %s738_s24 = smov 1   ;;  %vm249_vm0 = vcmp.eq.s32.totalorder %v876_v8, 16  ;;  %vm251_vm1 = vcmp.eq.s32.totalorder %v876_v8, 31  ;;  %vm247_vm2 = vcmp.eq.s32.totalorder %v876_v8, 0  ;;  %vm248_vm3 = vcmp.eq.s32.totalorder %v876_v8, 15 }
  0x2e   : > { %s205_s11 = scalar_lea.vmem %s1067_s2, %s542_s8  ;;  %s857_s27 = sld [smem:[#allocation3 + $0x7]]  ;;  %vm250_vm4 = vmor %vm247_vm2, %vm249_vm0  ;;  %vm253_vm5 = vcmp.eq.s32.totalorder %v876_v8, 32  ;;  %vm255_vm7 = vcmp.eq.s32.totalorder %v876_v8, 47  ;;  %vm257_vm9 = vcmp.eq.s32.totalorder %v876_v8, 48  ;;  %vm259_vm11 = vcmp.eq.s32.totalorder %v876_v8, 63 }
  0x2f   : > { %v216_v0 = vld [vmem:[%s205_s11] sm:$0x3]  ;;  %s739_s28 = smov 31   ;;  %s740_s29 = smov 33   ;;  %vm252_vm6 = vmor %vm248_vm3, %vm251_vm1  ;;  %vm261_vm14 = vcmp.eq.s32.totalorder %v876_v8, 64  ;;  %vm219_vm15 = vcmp.lt.s32.totalorder %v876_v8, 16 }
  0x30   : > { %361 = vrot.lane.b32.xlu1 %v216_v0, %s735_s12  ;;  %222 = vrot.lane.b32.xlu0 %v216_v0, %s736_s13  ;;  %v309_v1 = vstv %s854_s1  ;;  %s741_s30 = smov 112   ;;  %s742_s4 = smov 47   ;;  %vm254_vm8 = vmor %vm250_vm4, %vm253_vm5  ;;  %vm263_vm1 = vcmp.eq.s32.totalorder %v876_v8, 79  ;;  %vm265_vm5 = vcmp.eq.s32.totalorder %v876_v8, 80 }
  0x31   : > { %v863_v3 = vmul.f32 %v309_v1, %v216_v0  ;;  %s743_s5 = smov 32   ;;  %s744_s6 = smov 127   ;;  %vm256_vm10 = vmor %vm252_vm6, %vm255_vm7  ;;  %vm267_vm7 = vcmp.eq.s32.totalorder %v876_v8, 95 }
  0x32   : > { %v290_v2 = vstv %s546_s20  ;;  %s745_s7 = smov 113   ;;  %s746_s8 = smov 97   ;;  %vm258_vm13 = vmor %vm254_vm8, %vm257_vm9  ;;  %vm347_vm8 = vcmask 121856  }
  0x33   : > { %v865_v4 = vmul.f32 %v290_v2, %v216_v0  ;;  %s747_s9 = smov 111   ;;  %vm260_vm0 = vmor %vm256_vm10, %vm259_vm11  ;;  %s206_s10 = sld [smem:[#allocation3]]  ;;  %vm269_vm10 = vcmp.eq.s32.totalorder %v876_v8, 96 }
  0x34   : > { %383 = vrot.lane.b32.xlu1 %v216_v0, %s737_s22  ;;  %277 = vrot.lane.b32.xlu0 %v216_v0, %s738_s24  ;;  %v327_v5 = vstv %s857_s27  ;;  %vm262_vm4 = vmor %vm258_vm13, %vm261_vm14  ;;  %s545_s11 = sld [smem:[#allocation3 + $0x3]]  ;;  %s547_s12 = sld [smem:[#allocation3 + $0x5]]  ;;  %vm271_vm13 = vcmp.eq.s32.totalorder %v876_v8, 111  ;;  %vm280_vm14 = vcmask 7168  }
  0x35   : > { %v872_v6 = vmul.f32 %v327_v5, %v216_v0  ;;  %vm264_vm6 = vmor %vm260_vm0, %vm263_vm1  ;;  %s910_s20 = sld [smem:[#allocation3 + $0x6]]  ;;  %vm273_vm0 = vcmp.eq.s32.totalorder %v876_v8, 112  ;;  %s917_s22 = sld [smem:[#allocation3 + $0x8]] }
  0x36   : > { %vm266_vm9 = vmor %vm262_vm4, %vm265_vm5  ;;  %vm275_vm4 = vcmp.eq.s32.totalorder %v876_v8, 127  ;;  %vm220_vm5 = vcmp.ge.s32.totalorder %v876_v8, 112  ;;  %s196_s1 = sand.u32 1, %s716_s15  }
  0x37   : > { %vm268_vm11 = vmor %vm264_vm6, %vm267_vm7 }
  0x38   : > { %390 = vrot.lane.b32.xlu1 %v216_v0, %s739_s28  ;;  %386 = vrot.lane.b32.xlu0 %v216_v0, %s740_s29  ;;  %vm919_vm1 = vmor %vm268_vm11, %vm271_vm13  ;;  %s215_s28 = sld [smem:[#allocation2]]  ;;  %s552_s29 = sshll.u32 %s724_s17, 5 }
  0x39   : > { %v926_v22 = vstv %s206_s10  ;;  %vm276_vm7 = vmor %vm919_vm1, %vm275_vm4 }
  0x3a   : > { %v292_v26 = vstv %s545_s11  ;;  %v295_v27 = vstv %s547_s12  ;;  %v955_v46 = vsel %vm276_vm7, 1, %v748_v39 }
  0x3b   : > { %v953_v45 = vstv %s910_s20  ;;  %v961_v50 = vstv %s917_s22 }
  0x3c   : > { %225 = vrot.lane.b32.xlu1 %v216_v0, %s741_s30  ;;  %393 = vrot.lane.b32.xlu0 %v216_v0, %s742_s4 }
  0x40   : > { %400 = vrot.lane.b32.xlu0 %v863_v3, %s743_s5  ;;  %412 = vrot.lane.b32.xlu1 %v865_v4, %s736_s13  ;;  %s906_s13 = sld [smem:[#allocation3 + $0x2]] }
  0x44   : > { %420 = vrot.lane.b32.xlu0 %v872_v6, %s743_s5  ;;  %281 = vrot.lane.b32.xlu1 %v216_v0, %s744_s6 }
  0x46   : > { %v942_v34 = vstv %s906_s13 }
  0x48   : > { %340 = vrot.lane.b32.xlu1 %v216_v0, %s745_s7  ;;  %337 = vrot.lane.b32.xlu0 %v216_v0, %s746_s8  ;;  %s437_s7 = scalar_lea.sflag [#allocation4], %s196_s1  ;;  %s749_s8 = smov [#allocation6]  }
  0x4c   : > { %344 = vrot.lane.b32.xlu0 %v216_v0, %s747_s9  ;;  %s654_s9 = sshll.u32 %s749_s8, 4  ;;  %s655_s9 = int_to_ptr.vmem [resolvable:$false] %s654_s9 }
  0x4d   : > { %s656_s10 = scalar_lea.vmem %s655_s9, 64 }
  0xa2   : > { %v890_v9 = vpop.permute.xlu1 %361  ;;  %v223_v10 = vpop.permute.xlu0 %222 }
  0xa3   : > { %v229_v11 = vrot.slane %v223_v10, 1  ;;  %v231_v12 = vrot.slane %v223_v10, 7 }
  0xa5   : > { %v234_v13 = vsel %vm233_vm12, %v229_v11, %v231_v12 }
  0xa6   : > { %v384_v14 = vpop.permute.xlu1 %383  ;;  %v897_v15 = vpop.permute.xlu0 %277  ;;  %v899_v16 = vsel %vm219_vm15, %v234_v13, %v223_v10  ;;  %vm270_vm15 = vmor %vm266_vm9, %vm269_vm10  ;;  %vm288_vm9 = vcmp.eq.s32.totalorder %v955_v46, 1 }
  0xa7   : > { %301 = vrot.lane.b32.xlu0 %v899_v16, %s738_s24  ;;  %304 = vrot.lane.b32.xlu1 %v899_v16, %s744_s6  ;;  %v406_v21 = vsel %vm280_vm14, %v897_v15, %v384_v14  ;;  %vm274_vm6 = vmor %vm270_vm15, %vm273_vm0  ;;  %v310_v20 = vmul.f32 %v309_v1, %v899_v16 }
  0xa8   : > { %v948_v40 = vsel %vm274_vm6, 1, %v748_v39 }
  0xaa   : > { %v391_v17 = vpop.permute.xlu1 %390  ;;  %v387_v18 = vpop.permute.xlu0 %386 }
  0xab   : > { %v407_v19 = vsel %vm347_vm8, %v890_v9, %v391_v17  ;;  %354 = vrot.lane.b32.xlu1 %v863_v3, %s741_s30  ;;  %v389_v23 = vsel %vm280_vm14, %v384_v14, %v387_v18  ;;  %v298_v3 = vstv %s215_s28 }
  0xac   : > { %v408_v28 = vsel %vm247_vm2, %v407_v19, %v406_v21  ;;  %v409_v29 = vsel %vm248_vm3, %v406_v21, %v407_v19 }
  0xad   : > { %v410_v37 = vmul.f32 %v408_v28, %v292_v26  ;;  %v416_v42 = vmul.f32 %v409_v29, %v295_v27 }
  0xae   : > { %v226_v24 = vpop.permute.xlu1 %225  ;;  %v394_v25 = vpop.permute.xlu0 %393 }
  0xaf   : > { %v239_v30 = vrot.slane %v226_v24, 1  ;;  %v241_v31 = vrot.slane %v226_v24, 7  ;;  %v396_v32 = vsel %vm347_vm8, %v391_v17, %v394_v25 }
  0xb0   : > { %v398_v33 = vsel %vm248_vm3, %v389_v23, %v396_v32  ;;  %v397_v35 = vsel %vm247_vm2, %v396_v32, %v389_v23 }
  0xb1   : > { %v399_v36 = vmul.f32 %v397_v35, %v926_v22  ;;  %v243_v38 = vsel %vm233_vm12, %v239_v30, %v241_v31  ;;  %v404_v47 = vmul.f32 %v398_v33, %v942_v34  ;;  %vm285_vm12 = vcmp.eq.s32.totalorder %v948_v40, 1 }
  0xb2   : > { %v401_v41 = vpop.permute.xlu0 %400  ;;  %v413_v43 = vpop.permute.xlu1 %412  ;;  %v246_v44 = vsel %vm220_vm5, %v243_v38, %v226_v24  ;;  %v419_v53 = vmul.f32 %v397_v35, %v953_v45  ;;  %v424_v56 = vmul.f32 %v398_v33, %v961_v50 }
  0xb3   : > { %v403_v48 = vadd.f32 %v401_v41, %v399_v36  ;;  %v415_v49 = vadd.f32 %v413_v43, %v410_v37  ;;  %319 = vrot.lane.b32.xlu0 %v246_v44, %s738_s24  ;;  %322 = vrot.lane.b32.xlu1 %v246_v44, %s744_s6  ;;  %v328_v37 = vmul.f32 %v327_v5, %v246_v44  ;;  %s541_s24 = sshll.u32 %s196_s1, 1  ;;  %s1018_s6 = scalar_lea.hbm %s1068_s3, %s552_s29 }
  0xb4   : > { %s198_s27 = scalar_lea.vmem [#allocation6], %s541_s24 }
  0xb5   : > { %v405_v51 = vadd.f32 %v404_v47, %v403_v48  ;;  %v417_v52 = vadd.f32 %v416_v42, %v415_v49 }
  0xb6   : > { %v421_v54 = vpop.permute.xlu0 %420  ;;  %v282_v55 = vpop.permute.xlu1 %281 }
  0xb7   : > { %v423_v57 = vadd.f32 %v421_v54, %v419_v53  ;;  %v364_v58 = vsel %vm347_vm8, %v282_v55, %v890_v9  ;;  %375 = vrot.lane.b32.xlu0 %v872_v6, %s741_s30  ;;  %v286_v59 = vsel %vm285_vm12, %v282_v55, %v897_v15  ;;  %v289_v60 = vsel %vm288_vm9, %v897_v15, %v282_v55 }
  0xb8   : > { %v293_v61 = vmul.f32 %v292_v26, %v286_v59  ;;  %v418_v62 = vadd.f32 %v417_v52, %v405_v51  ;;  %v296_v0 = vmul.f32 %v295_v27, %v289_v60 }
  0xb9   : > { %v425_v63 = vadd.f32 %v424_v56, %v423_v57 }
  0xba   : > { %v341_v2 = vpop.permute.xlu1 %340  ;;  %v338_v7 = vpop.permute.xlu0 %337  ;;  %v294_v9 = vadd.f32 %v293_v61, %v865_v4 }
  0xbb   : > { %v426_v10 = vadd.f32 %v425_v63, %v418_v62  ;;  %v360_v6 = vsel %vm280_vm14, %v341_v2, %v897_v15  ;;  %v343_v19 = vsel %vm280_vm14, %v338_v7, %v341_v2 }
  0xbc   : > { %v365_v11 = vsel %vm247_vm2, %v364_v58, %v360_v6  ;;  %v366_v12 = vsel %vm248_vm3, %v360_v6, %v364_v58  ;;  %v297_v13 = vadd.f32 %v296_v0, %v294_v9 }
  0xbd   : > { %v367_v14 = vmul.f32 %v365_v11, %v292_v26  ;;  %v369_v17 = vmul.f32 %v366_v12, %v295_v27  ;;  %v427_v18 = vadd.f32 %v426_v10, %v298_v3 }
  0xbe   : > { %v345_v21 = vpop.permute.xlu0 %344  ;;  %v299_v23 = vadd.f32 %v298_v3, %v297_v13 }
  0xbf   : > { %v368_v24 = vadd.f32 %v367_v14, %v865_v4  ;;  %431 = vrot.lane.b32.xlu1 %v427_v18, %s741_s30  ;;  %v348_v15 = vsel %vm347_vm8, %v345_v21, %v282_v55  ;;  %s451_s30 = sshll.u32 %s198_s27, 4  ;;  %s1020_s30 = int_to_ptr.vmem [resolvable:$true] %s451_s30 }
  0xc0   : > { %v350_v25 = vsel %vm248_vm3, %v343_v19, %v348_v15  ;;  %v311_v26 = vadd.f32 %v310_v20, %v299_v23  ;;  %v349_v27 = vsel %vm247_vm2, %v348_v15, %v343_v19  ;;  %vm434_vm2 = vcmask 1042305   ;;  %s650_s17 = scalar_lea.vmem %s1020_s30, 32  ;;  %p657_p0 = scmp.lt.s32.totalorder %s1020_s30, %s655_s9 }
  0xc1   : > { %v370_v28 = vadd.f32 %v369_v17, %v368_v24  ;;  %v351_v30 = vmul.f32 %v349_v27, %v926_v22  ;;  %v358_v8 = vmul.f32 %v350_v25, %v942_v34  ;;  %v372_v49 = vmul.f32 %v349_v27, %v953_v45  ;;  %p651_p10 = scmp.ne.s32.totalorder %s1020_s30, %s650_s17  ;;  %p658_p1 = scmp.lt.s32.totalorder %s656_s10, %s650_s17 }
  0xc2   : > { %v379_v53 = vmul.f32 %v350_v25, %v961_v50  ;;  %vm428_vm3 = vcmask 122880  }
  0xc3   : > { %p652_p11 = pnand %p651_p10, %p813_p4  ;;  %p659_p2 = por %p658_p1, %p657_p0 }
  0xc5   : > { %p653_p13 = pneg %p652_p11 }
  0xc7   : > { %p660_p3 = pnand %p659_p2, %p653_p13 }
 0x119   : > { %v302_v29 = vpop.permute.xlu0 %301  ;;  %v305_v1 = vpop.permute.xlu1 %304 }
 0x11a   : > { %v307_v16 = vsel %vm285_vm12, %v305_v1, %v302_v29  ;;  %v308_v4 = vsel %vm288_vm9, %v302_v29, %v305_v1 }
 0x11b   : > { %v313_v31 = vmul.f32 %v926_v22, %v307_v16  ;;  %v316_v33 = vmul.f32 %v942_v34, %v308_v4 }
 0x11d   : > { %v314_v32 = vadd.f32 %v313_v31, %v311_v26  ;;  %v355_v35 = vpop.permute.xlu1 %354 }
 0x11e   : > { %v357_v36 = vadd.f32 %v355_v35, %v351_v30 }
 0x11f   : > { %v317_v38 = vadd.f32 %v316_v33, %v314_v32 }
 0x120   : > { %v359_v39 = vadd.f32 %v358_v8, %v357_v36 }
 0x121   : > { %v329_v41 = vadd.f32 %v328_v37, %v317_v38 }
 0x122   : > { %v371_v42 = vadd.f32 %v370_v28, %v359_v39 }
 0x125   : > { %v320_v43 = vpop.permute.xlu0 %319  ;;  %v323_v47 = vpop.permute.xlu1 %322 }
 0x126   : > { %v325_v22 = vsel %vm285_vm12, %v323_v47, %v320_v43  ;;  %v326_v48 = vsel %vm288_vm9, %v320_v43, %v323_v47 }
 0x127   : > { %v331_v34 = vmul.f32 %v953_v45, %v325_v22  ;;  %v334_v44 = vmul.f32 %v961_v50, %v326_v48 }
 0x129   : > { %v332_v5 = vadd.f32 %v331_v34, %v329_v41  ;;  %v376_v51 = vpop.permute.xlu0 %375 }
 0x12a   : > { %v378_v52 = vadd.f32 %v376_v51, %v372_v49 }
 0x12b   : > { %v335_v54 = vadd.f32 %v334_v44, %v332_v5 }
 0x12c   : > { %v380_v55 = vadd.f32 %v379_v53, %v378_v52 }
 0x12d   : > { %336 = vst [vmem:[%s198_s27] sm:$0x3] %v335_v54 }
 0x12e   : > { %v381_v40 = vadd.f32 %v380_v55, %v371_v42 }
 0x130   : > { %v382_v46 = vadd.f32 %v381_v40, %v298_v3 }
 0x131   : > { %v432_v45 = vpop.permute.xlu1 %431 }
 0x132   : > { %435 = vst.msk [vmem:[%s198_s27] sm:$0x2] %vm434_vm2, %v432_v45 }
 0x133   : > { %429 = vst.msk [vmem:[%s198_s27] sm:$0x1] %vm428_vm3, %v382_v46 }
 0x134   : > { %663 = shalt.err (!%p660_p3)
}
 0x135   : > { %s664_s11 = scalar_lea.hbm %s1018_s6, 32  ;;  %s668_s20 = scalar_lea.hbm %s1068_s3, 64 }
 0x136   : > { %p665_p5 = scmp.ne.s32.totalorder %s1018_s6, %s664_s11  ;;  %p669_p9 = scmp.lt.u32.totalorder %s1018_s6, %s1068_s3 }
 0x137   : > { %p670_p12 = scmp.lt.u32.totalorder %s668_s20, %s664_s11  ;;  %p672_p11 = scmp.lt.u32.totalorder %s664_s11, %s1018_s6 }
 0x138   : > { %p666_p6 = pnand %p665_p5, %p813_p4 }
 0x139   : > { %p671_p10 = por %p670_p12, %p669_p9 }
 0x13a   : > { %p667_p7 = pneg %p666_p6 }
 0x13b   : > { %p673_p13 = por %p672_p11, %p671_p10 }
 0x13d   : > { %p674_p0 = pnand %p673_p13, %p667_p7 }
 0x13f   : > { %677 = shalt.err (!%p674_p0)
}
 0x140   : > { %559 = dma.vmem_to_hbm [thread:$0]  (%p813_p4), %s1020_s30, 32, %s1018_s6, %s437_s7  }
 0x141 PF: > { %p571_p1 = scmp.ge.s32.totalorder %s732_s19, 2  ;;  %s463_s1 = sand.u32 1, %s712_s14  }
 0x142   : > { %s464_s24 = scalar_lea.sflag [#allocation4], %s463_s1 }
 0x143   : > { %p566_p2 = pnand %p571_p1, %p820_p8 }
 0x145   : > { %707 = dma.done.wait (!%p566_p2), %s464_s24, 32  }
 0x146   : > { %709 = vsyncadd (!%p566_p2), %s464_s24, 4294967264  ;;  %s18_s19 = sadd.s32 1, %s732_s19   ;;  %s1075_s14 = smov %s716_s15 }
 0x147   : > { %p15_p3 = scmp.ge.s32.totalorder %s18_s19, 4   ;;  %s1076_s15 = smov %s720_s16 }
 0x148   : > { %s1077_s16 = smov %s826_s26  ;;  %s1078_s17 = smov %s728_s18 }
 0x149   : > { %s1079_s18 = smov %s1081_s21  ;;  %17 = sbr.rel (!%p15_p3) target bundleno = 7 (0x7), region = 72 }
 0x150   :  { %469 = vsyncpa [#allocation4], 1 }
 0x151   :  { %471 = vsyncpa [#allocation4 + $0x1], 1 }
 0x152   :  { %472 = vsyncpa [#allocation5], 1 }
 0x153   :  { %474 = vsyncpa [#allocation5 + $0x1], 1 }

</bundles_post_ra>
